<compile_context>
chip_gen: v6e
topology: v6e:2x2x1
jax: 0.10.0
libtpu: 0.0.40
codegen_flags: <defaults>
</compile_context>

<pallas_src>
import numpy as np

import jax
import jax.numpy as jnp
from jax.experimental import pallas as pl
from jax.experimental.pallas import tpu as pltpu


# ----------------------------- kernel -------------------------------------- #

def _affine_matmul_kernel(x_ref, m_ref, b_ref, o_ref):
    # (tm, Din) @ (Din, Dout) on the MXU with f32 accumulation, + bias row.
    x_tile = x_ref[...].astype(jnp.float32)
    acc = jnp.dot(x_tile, m_ref[...], preferred_element_type=jnp.float32)
    o_ref[...] = (acc + b_ref[...]).astype(o_ref.dtype)


# ----------------------------- wrapper ------------------------------------- #

def _round_up(x: int, m: int) -> int:
    return ((x + m - 1) // m) * m


def pca_whitening_forward(x, x_mean, eigvec, variance_sqrt, featrange, featmin,
                          *, inverse: bool = False, minmax: bool = True,
                          block_rows: int = 2048, out_dtype=None,
                          min_grid_steps: int = 8, min_rows_per_step: int = 256):
    """Pallas implementation of PCAWhitening.forward (whiten or unwhiten)."""
    x = jnp.asarray(x)
    compute_dtype = x.dtype if x.dtype == jnp.bfloat16 else jnp.float32
    x = x.astype(compute_dtype)
    if out_dtype is None:
        out_dtype = compute_dtype   # bf16 in -> bf16 out (halves writeback bytes)

    # Parameters folded in f32 for precision.
    x_mean = jnp.asarray(x_mean, jnp.float32)
    eigvec = jnp.asarray(eigvec, jnp.float32)
    vsqrt = jnp.asarray(variance_sqrt, jnp.float32)
    frange = jnp.asarray(featrange, jnp.float32)
    fmin = jnp.asarray(featmin, jnp.float32)

    K, D = eigvec.shape
    N = x.shape[0]

    # --- fold everything into (M, bias) so the kernel is matmul + add ------- #
    if not inverse:
        # 2*(((x - x_mean) @ E^T)/vsqrt - fmin)/frange - 1
        if minmax:
            col_scale = 2.0 / (vsqrt * frange)                 # (K,)
            M = eigvec.T * col_scale[None, :]                  # (D, K)
            bias = -(x_mean @ M) - 2.0 * fmin / frange - 1.0   # (K,)
        else:
            M = eigvec.T / vsqrt[None, :]
            bias = -(x_mean @ M)
        in_dim, out_dim = D, K
    else:
        # ((frange*(x+1)/2 + fmin) * vsqrt) @ E + x_mean
        if minmax:
            row_scale = frange * vsqrt * 0.5                   # (K,)
            M = eigvec * row_scale[:, None]                    # (K, D)
            bias = ((frange * 0.5 + fmin) * vsqrt) @ eigvec + x_mean
        else:
            M = eigvec * vsqrt[:, None]
            bias = x_mean
        in_dim, out_dim = K, D

    # M and bias stay f32: tiny and VMEM-resident via constant index_map, so full
    # precision costs no HBM bandwidth even on the bf16 input path.
    M = M.astype(jnp.float32)
    bias_2d = bias.reshape(1, out_dim).astype(jnp.float32)

    # --- row tiling (no padding / slicing of the big streams) --------------- #
    # Sublane multiple: 8 for 4-byte tiles, 16 for 2-byte (bf16) tiles.
    sub = 16 if (np.dtype(compute_dtype).itemsize == 2
                 or np.dtype(out_dtype).itemsize == 2) else 8
    tm = min(block_rows, _round_up(max(N, 1), sub))
    # Keep enough grid steps for v7x 2-TC megacore sharding / DMA overlap on big
    # batches, but never shard small batches into pure per-step overhead.
    if N >= min_grid_steps * min_rows_per_step and pl.cdiv(N, tm) < min_grid_steps:
        tm = max(sub, _round_up(pl.cdiv(N, min_grid_steps), sub))
    grid = (pl.cdiv(N, tm),)            # ragged last block handled by Pallas

    x_bytes = N * in_dim * np.dtype(compute_dtype).itemsize
    out_bytes = N * out_dim * np.dtype(out_dtype).itemsize
    param_bytes = (int(M.size) + int(bias_2d.size)) * 4
    cost = pl.CostEstimate(flops=2 * N * in_dim * out_dim,
                           transcendentals=0,
                           bytes_accessed=int(x_bytes + out_bytes + param_bytes))

    out = pl.pallas_call(
        _affine_matmul_kernel,
        out_shape=jax.ShapeDtypeStruct((N, out_dim), out_dtype),
        grid_spec=pltpu.PrefetchScalarGridSpec(
            num_scalar_prefetch=0,
            grid=grid,
            in_specs=[
                pl.BlockSpec((tm, in_dim), lambda i: (i, 0)),       # x row tile
                pl.BlockSpec((in_dim, out_dim), lambda i: (0, 0)),  # fused matrix (VMEM-resident)
                pl.BlockSpec((1, out_dim), lambda i: (0, 0)),       # fused bias (VMEM-resident)
            ],
            out_specs=pl.BlockSpec((tm, out_dim), lambda i: (i, 0)),
        ),
        compiler_params=pltpu.CompilerParams(
            dimension_semantics=("parallel",)),
        cost_estimate=cost,
    )(x, M, bias_2d)

    return out


# ------------------------- reference (plain JAX) ---------------------------- #

def pca_whitening_ref(x, x_mean, eigvec, variance_sqrt, featrange, featmin,
                      *, inverse=False, minmax=True):
    x = jnp.asarray(x, jnp.float32)
    if inverse:
        xb = featrange * ((x + 1.0) / 2.0) + featmin if minmax else x
        rot = xb * variance_sqrt
        return rot @ eigvec + x_mean
    rot = (x - x_mean) @ eigvec.T
    u = rot / variance_sqrt
    if minmax:
        u = 2.0 * (u - featmin) / featrange - 1.0
    return u


# --------------------------------- main ------------------------------------- #

if __name__ == "__main__":
    key = jax.random.PRNGKey(0)
    N, D, dof = 16, 32, 6
    K = D - dof  # 26 retained principal components

    k1, k2, k3, k4, k5, k6, k7, k8 = jax.random.split(key, 8)

    # Deterministic synthetic "PCA" buffers (shapes match the module's __init__).
    x_mean = jax.random.normal(k1, (D,), jnp.float32)
    q, _ = jnp.linalg.qr(jax.random.normal(k2, (D, D), jnp.float32))
    eigvec = q[:K, :]                                              # (K, D), orthonormal rows
    variance_sqrt = jax.random.uniform(k3, (K,), jnp.float32, 0.5, 2.0)
    featmin = jax.random.normal(k4, (K,), jnp.float32) - 2.0
    featrange = jax.random.uniform(k5, (K,), jnp.float32, 1.0, 4.0)

    x = jax.random.normal(k6, (N, D), jnp.float32)

    # Forward (whitening) path: inverse=False, minmax=True (module defaults).
    out = pca_whitening_forward(x, x_mean, eigvec, variance_sqrt,
                                featrange, featmin, inverse=False, minmax=True)
    jax.block_until_ready(out)
    ref = pca_whitening_ref(x, x_mean, eigvec, variance_sqrt,
                            featrange, featmin, inverse=False, minmax=True)
    assert out.shape == (N, K)
    assert out.dtype == jnp.float32
    assert jnp.allclose(out, ref, atol=5e-4, rtol=5e-4)

    # Inverse (unwhitening) path.
    out_inv = pca_whitening_forward(out, x_mean, eigvec, variance_sqrt,
                                    featrange, featmin, inverse=True, minmax=True)
    jax.block_until_ready(out_inv)
    ref_inv = pca_whitening_ref(ref, x_mean, eigvec, variance_sqrt,
                                featrange, featmin, inverse=True, minmax=True)
    assert out_inv.shape == (N, D)
    assert jnp.allclose(out_inv, ref_inv, atol=5e-4, rtol=5e-4)

    # minmax=False paths.
    out_nm = pca_whitening_forward(x, x_mean, eigvec, variance_sqrt,
                                   featrange, featmin, inverse=False, minmax=False)
    ref_nm = pca_whitening_ref(x, x_mean, eigvec, variance_sqrt,
                               featrange, featmin, inverse=False, minmax=False)
    assert jnp.allclose(out_nm, ref_nm, atol=5e-4, rtol=5e-4)

    # Ragged batch + multi-step grid (cdiv grid, no wrapper pad/slice, small tile).
    x_rag = jax.random.normal(k7, (300, D), jnp.float32)
    out_rag = pca_whitening_forward(x_rag, x_mean, eigvec, variance_sqrt,
                                    featrange, featmin, inverse=False, minmax=True,
                                    block_rows=128)
    jax.block_until_ready(out_rag)
    ref_rag = pca_whitening_ref(x_rag, x_mean, eigvec, variance_sqrt,
                                featrange, featmin, inverse=False, minmax=True)
    assert out_rag.shape == (300, K)
    assert jnp.allclose(out_rag, ref_rag, atol=5e-4, rtol=5e-4)

    # Larger batch: exercises the min-grid-steps guard (>= 8 steps with the default
    # 2048-row tile cap) plus a ragged last block.
    x_big = jax.random.normal(k8, (2083, D), jnp.float32)
    out_big = pca_whitening_forward(x_big, x_mean, eigvec, variance_sqrt,
                                    featrange, featmin, inverse=False, minmax=True)
    jax.block_until_ready(out_big)
    ref_big = pca_whitening_ref(x_big, x_mean, eigvec, variance_sqrt,
                                featrange, featmin, inverse=False, minmax=True)
    assert out_big.shape == (2083, K)
    assert jnp.allclose(out_big, ref_big, atol=5e-4, rtol=5e-4)

    # bf16 input path: bf16 in / bf16 out halves both dominant HBM streams; the
    # fused matrix stays f32, so error is only x/out quantization.
    out_bf16 = pca_whitening_forward(x.astype(jnp.bfloat16), x_mean, eigvec,
                                     variance_sqrt, featrange, featmin,
                                     inverse=False, minmax=True)
    jax.block_until_ready(out_bf16)
    assert out_bf16.dtype == jnp.bfloat16
    assert jnp.allclose(out_bf16.astype(jnp.float32), ref, atol=1e-1, rtol=5e-2)

    print("KERNEL_OK")
</pallas_src>

<mosaic_0001>
module attributes {stable_mosaic.version = 11 : i64} {
  func.func @_affine_matmul_kernel(%arg0: i32, %arg1: memref<16x32xf32, #tpu.memory_space<vmem>>, %arg2: memref<32x26xf32, #tpu.memory_space<vmem>>, %arg3: memref<1x26xf32, #tpu.memory_space<vmem>>, %arg4: memref<16x26xf32, #tpu.memory_space<vmem>>) attributes {dimension_semantics = [#tpu.dimension_semantics<parallel>], iteration_bounds = array<i64: 1>, scalar_prefetch = 0 : i64, scratch_operands = 0 : i64, tpu.core_type = #tpu.core_type<tc>, window_params = [{transform_indices = @transform_0, window_bounds = array<i64: 16, 32>}, {pipeline_mode = #tpu.pipeline_mode<synchronous>, transform_indices = @transform_1, window_bounds = array<i64: 32, 26>}, {pipeline_mode = #tpu.pipeline_mode<synchronous>, transform_indices = @transform_2, window_bounds = array<i64: 1, 26>}, {transform_indices = @transform_3, window_bounds = array<i64: 16, 26>}]} {
    %c0 = arith.constant 0 : index
    %c0_0 = arith.constant 0 : index
    %0 = vector.load %arg1[%c0, %c0_0] : memref<16x32xf32, #tpu.memory_space<vmem>>, vector<16x32xf32>
    %c0_1 = arith.constant 0 : index
    %c0_2 = arith.constant 0 : index
    %1 = vector.load %arg2[%c0_1, %c0_2] : memref<32x26xf32, #tpu.memory_space<vmem>>, vector<32x26xf32>
    %cst = arith.constant dense<0.000000e+00> : vector<16x26xf32>
    %2 = tpu.matmul %0, %1, %cst {dimension_numbers = #tpu.dot_dimension_numbers<[1], [0], [0], [1], [0, 0, 1, 1], [], []>} : vector<16x32xf32>, vector<32x26xf32>, vector<16x26xf32> -> vector<16x26xf32>
    %c0_3 = arith.constant 0 : index
    %c0_4 = arith.constant 0 : index
    %3 = vector.load %arg3[%c0_3, %c0_4] : memref<1x26xf32, #tpu.memory_space<vmem>>, vector<1x26xf32>
    %4 = vector.broadcast %3 : vector<1x26xf32> to vector<16x26xf32>
    %5 = arith.addf %2, %4 : vector<16x26xf32>
    %c0_5 = arith.constant 0 : index
    %c0_6 = arith.constant 0 : index
    %6 = vector.load %arg4[%c0_5, %c0_6] : memref<16x26xf32, #tpu.memory_space<vmem>>, vector<16x26xf32>
    tpu.vector_store %arg4[%c0_5, %c0_6], %5 {strides = array<i32>} : memref<16x26xf32, #tpu.memory_space<vmem>>, vector<16x26xf32>,
    return
  }
  func.func @transform_0(%arg0: i32) -> (i32, i32) {
    %c0_i32 = arith.constant 0 : i32
    %c0_i32_0 = arith.constant 0 : i32
    return %arg0, %c0_i32 : i32, i32
  }
  func.func @transform_1(%arg0: i32) -> (i32, i32) {
    %c0_i32 = arith.constant 0 : i32
    %c0_i32_0 = arith.constant 0 : i32
    %c0_i32_1 = arith.constant 0 : i32
    return %c0_i32, %c0_i32_0 : i32, i32
  }
  func.func @transform_2(%arg0: i32) -> (i32, i32) {
    %c0_i32 = arith.constant 0 : i32
    %c0_i32_0 = arith.constant 0 : i32
    %c0_i32_1 = arith.constant 0 : i32
    return %c0_i32, %c0_i32_0 : i32, i32
  }
  func.func @transform_3(%arg0: i32) -> (i32, i32) {
    %c0_i32 = arith.constant 0 : i32
    %c0_i32_0 = arith.constant 0 : i32
    return %arg0, %c0_i32 : i32, i32
  }
}

</mosaic_0001>

<bundles_post_ra>
// kernel: tpu_custom_call.1
= control target key start
LH: loop header
LB: loop body
LE: loop exit
PB: predicated region body
PF: predicated region fallthrough
CT: control target
= control target key end

     0   :  { %8 = vsyncpa [#allocation3], 0  ;;  %s298_s0 = inlined_call_operand.hbm [shape: f32[16,32], index: 0, kind: input, shape index: {}]   ;;  %s299_s1 = inlined_call_operand.hbm [shape: f32[32,26], index: 1, kind: input, shape index: {}]   ;;  %s300_s2 = inlined_call_operand.vmem [shape: f32[1,26], index: 2, kind: input, shape index: {}]   ;;  %s301_s3 = inlined_call_operand.hbm [shape: f32[16,26], index: 3, kind: output, shape index: {}]  }
   0x1   :  { %9 = vsyncpa [#allocation6], 0 }
   0x2   :  { %10 = vsyncpa [#allocation4], 0  ;;  %s250_s12 = smov [#allocation2]  }
   0x3   :  { %s16_s13 = sshll.u32 %s250_s12, 4  ;;  %s17_s13 = int_to_ptr.vmem [resolvable:$true] %s16_s13 }
   0x4   :  { %s192_s14 = scalar_lea.vmem %s17_s13, 256  ;;  %p197_p1 = scmp.lt.s32.totalorder %s17_s13, %s17_s13 }
   0x5   :  { %p193_p0 = scmp.ne.s32.totalorder %s17_s13, %s192_s14  ;;  %p198_p2 = scmp.lt.s32.totalorder %s192_s14, %s192_s14 }
   0x7   :  { %p199_p3 = por %p198_p2, %p197_p1 }
   0x9   :  { %p200_p4 = pnand %p199_p3, %p193_p0 }
   0xb   :  { %203 = shalt.err (!%p200_p4)
}
   0xc   :  { %s251_s15 = smov 128   ;;  %s252_s16 = smov 8  }
   0xd   :  { %22 = dma.hbm_to_vmem [thread:$0]  %s298_s0, 256, %s17_s13, [#allocation3], %s251_s15, %s251_s15, %s252_s16  }
   0xe   :  { %s253_s19 = smov [#allocation5]  }
   0xf   :  { %s28_s20 = sshll.u32 %s253_s19, 4  ;;  %s29_s20 = int_to_ptr.vmem [resolvable:$true] %s28_s20 }
  0x10   :  { %s212_s21 = scalar_lea.vmem %s29_s20, 512  ;;  %p217_p6 = scmp.lt.s32.totalorder %s29_s20, %s29_s20 }
  0x11   :  { %p213_p5 = scmp.ne.s32.totalorder %s29_s20, %s212_s21  ;;  %p218_p7 = scmp.lt.s32.totalorder %s212_s21, %s212_s21 }
  0x13   :  { %p219_p8 = por %p218_p7, %p217_p6 }
  0x15   :  { %p220_p9 = pnand %p219_p8, %p213_p5 }
  0x17   :  { %223 = shalt.err (!%p220_p9)
}
  0x18   :  { %34 = dma.hbm_to_vmem [thread:$0]  %s299_s1, 512, %s29_s20, [#allocation6], %s251_s15, %s251_s15, %s252_s16  }
  0x19   :  { %244 = dma.done.wait [#allocation3], 256  }
  0x1a   :  { %245 = vsyncadd [#allocation3], 4294967040 }
  0x1b   :  { %246 = dma.done.wait [#allocation6], 512  }
  0x1c   :  { %247 = vsyncadd [#allocation6], 4294966784  ;;  %vm56_vm0 = vcmask 261120   ;;  %v48_v0 = vld [vmem:[#allocation5 + $0x18] sm:$0xff]  ;;  %v47_v1 = vld [vmem:[#allocation5 + $0x10] sm:$0xff]  ;;  %vm138_vm1 = vcmask 211968  }
  0x1d   :  { %168 = vmatprep.subr.mxu0 %v48_v0  ;;  %v43_v2 = vld [vmem:[#allocation2] sm:$0xff]  ;;  %v46_v3 = vld [vmem:[#allocation5 + $0x8] sm:$0xff]  ;;  %v45_v4 = vld [vmem:[#allocation5] sm:$0xff]  ;;  %s254_s24 = smov [#allocation7]  }
  0x1e   :  { %169 = vmatpush3.msra.mxu0 %v48_v0  ;;  %176 = vmatprep.mubr.msk.f32.mxu0 %vm56_vm0, %v43_v2  ;;  %v44_v5 = vld [vmem:[#allocation2 + $0x8] sm:$0xff]  ;;  %v159_v6 = vld [vmem:[%s300_s2] ss:$0 sm:$0xff]  ;;  %s146_s25 = sshll.u32 %s254_s24, 4  ;;  %s147_s25 = int_to_ptr.vmem [resolvable:$true] %s146_s25 }
  0x1f   :  { %170 = vmatprep.subr.mxu0 %v47_v1  ;;  %s224_s26 = scalar_lea.vmem %s147_s25, 256  ;;  %p229_p11 = scmp.lt.s32.totalorder %s147_s25, %s147_s25 }
  0x20   :  { %171 = vmatpush3.msra.mxu0 %v47_v1  ;;  %p225_p10 = scmp.ne.s32.totalorder %s147_s25, %s224_s26  ;;  %p230_p12 = scmp.lt.s32.totalorder %s224_s26, %s224_s26 }
  0x21   :  { %172 = vmatprep.subr.mxu0 %v46_v3 }
  0x22   :  { %173 = vmatpush3.msra.mxu0 %v46_v3  ;;  %p231_p13 = por %p230_p12, %p229_p11 }
  0x23   :  { %174 = vmatprep.subr.mxu0 %v45_v4 }
  0x24   :  { %175 = vmatpush3.msra.mxu0 %v45_v4  ;;  %p232_p0 = pnand %p231_p13, %p225_p10 }
  0x25   :  { %177 = vmatmul.mubr.msk.f32.vlgmr.msra.gmra.mxu0 %vm56_vm0, %v44_v5 }
  0xe5   :  { %v178_v7 = vpop.f32.mrf.mxu0 }
  0xe6   :  { %v135_v8 = vadd.f32 %v178_v7, %v159_v6 }
  0xe7   :  { %v129_v9 = vpop.f32.mrf.mxu0 }
  0xe8   :  { %v130_v10 = vadd.f32 %v159_v6, %v129_v9  ;;  %140 = vst.msk [vmem:[#allocation7 + $0x8] sm:$0xff] %vm138_vm1, %v135_v8 }
  0xea   :  { %139 = vst.msk [vmem:[#allocation7] sm:$0xff] %vm138_vm1, %v130_v10 }
  0xeb   :  { %235 = shalt.err (!%p232_p0)
}
  0xec   :  { %152 = dma.vmem_to_hbm [thread:$0]  %s147_s25, 256, %s301_s3, [#allocation4], %s251_s15, %s251_s15, %s252_s16  }
  0xed   :  { %248 = dma.done.wait [#allocation4], 256  }
  0xee   :  { %249 = vsyncadd [#allocation4], 4294967040 }
  0xef   :  { %156 = vsyncpa [#allocation3], 1 }
  0xf0   :  { %157 = vsyncpa [#allocation6], 1 }
  0xf1   :  { %158 = vsyncpa [#allocation4], 1 }

</bundles_post_ra>
